<compile_context>
chip_gen: v7x
topology: tpu7x:2x2x1
jax: 0.10.0
libtpu: 0.0.40
codegen_flags: <defaults>
</compile_context>

<pallas_src>
import jax
import jax.numpy as jnp
from jax.experimental import pallas as pl
from jax.experimental.pallas import tpu as pltpu

IN_F = 4    # input features
HID_F = 5   # hidden features
OUT_F = 3   # output classes

# 512 sublane-rows * 128 lanes = 65536 samples per grid step.
# Per-step VMEM: (IN_F + OUT_F) * 512 * 128 * 4 B = 1.75 MiB; double-buffered
# ~3.5 MiB -- comfortably inside the scoped VMEM default on v5e/v6e/v7x,
# while amortizing the ~0.35 us fixed per-step cost over ~1.75 MiB of traffic.
MAX_TILE_ROWS = 512


def _round_up(a, b):
    return (a + b - 1) // b * b


def _mlp_kernel(w1_ref, b1_ref, w2_ref, b2_ref, x_ref, o_ref):
    """x_ref: (4, R, 128) f32 VMEM, o_ref: (3, R, 128) f32 VMEM.

    Batch occupies both the sublane (R) and lane (128) axes, so every VPU op
    processes a full vreg and every store is a full-tile unmasked store.
    Weights/biases are scalars in SMEM, broadcast-FMA'd on the VPU; the MXU
    is deliberately unused (it would be <0.2% utilised at these dims).
    """
    x_rows = [x_ref[k] for k in range(IN_F)]            # each (R, 128)

    # Layer 1: h_j = relu(sum_k w1[k, j] * x_k + b1[j])
    h_rows = []
    for j in range(HID_F):
        acc = x_rows[0] * w1_ref[0, j]
        for k in range(1, IN_F):
            acc = acc + x_rows[k] * w1_ref[k, j]
        h_rows.append(jnp.maximum(acc + b1_ref[j], 0.0))

    # Layer 2: y_j = sum_k w2[k, j] * h_k + b2[j]
    for j in range(OUT_F):
        acc = h_rows[0] * w2_ref[0, j]
        for k in range(1, HID_F):
            acc = acc + h_rows[k] * w2_ref[k, j]
        o_ref[j] = acc + b2_ref[j]                      # full-tile store


@jax.jit
def iris_classifier_forward(x, w1, b1, w2, b2):
    """x: (B, 4) f32; w1: (4, 5); b1: (5,); w2: (5, 3); b2: (3,) -> (B, 3)."""
    B = x.shape[0]
    rows = pl.cdiv(B, 128)                              # rows of 128 samples

    # Keep >=2 grid steps whenever there is enough data (v7x 2-TC sharding of
    # the "parallel" axis); cap the tile so the double-buffered working set
    # stays a few MiB on every generation.  tile_rows is a multiple of 8 so
    # the block obeys the (8, 128) constraint.
    tile_rows = min(MAX_TILE_ROWS, _round_up(max(pl.cdiv(rows, 2), 1), 8))
    rows_pad = _round_up(rows, tile_rows)
    b_pad = rows_pad * 128
    grid = (rows_pad // tile_rows,)

    # (B, 4) -> (4, rows_pad, 128): batch-on-(sublane, lane) layout.  Under
    # jit the minimal pad + transpose + reshape fuse into one copy pass (no
    # standalone zero-filled second copy); the reshape itself is free.
    # TODO(synk): callers that can keep activations feature-major end to end
    # could call pallas_call directly and skip this transpose and the output
    # transpose entirely (~1.5-2x end-to-end at very large B).
    x_p = jnp.pad(x, ((0, b_pad - B), (0, 0)))
    x_t = x_p.T.reshape(IN_F, rows_pad, 128)

    smem = pl.BlockSpec(memory_space=pltpu.MemorySpace.SMEM)
    cost = pl.CostEstimate(
        flops=2 * b_pad * (IN_F * HID_F + HID_F * OUT_F),
        transcendentals=0,
        bytes_accessed=b_pad * 4 * (IN_F + OUT_F)
        + 4 * (IN_F * HID_F + HID_F + HID_F * OUT_F + OUT_F),
    )

    out_t = pl.pallas_call(
        _mlp_kernel,
        out_shape=jax.ShapeDtypeStruct((OUT_F, rows_pad, 128), jnp.float32),
        grid=grid,
        in_specs=[
            smem,                                                    # w1 (4, 5)
            smem,                                                    # b1 (5,)
            smem,                                                    # w2 (5, 3)
            smem,                                                    # b2 (3,)
            pl.BlockSpec((IN_F, tile_rows, 128), lambda i: (0, i, 0)),
        ],
        out_specs=pl.BlockSpec((OUT_F, tile_rows, 128), lambda i: (0, i, 0)),
        compiler_params=pltpu.CompilerParams(
            dimension_semantics=("parallel",)),
        cost_estimate=cost,
    )(w1, b1, w2, b2, x_t)

    # Back to the PyTorch (B, 3) layout; the padded tail is sliced off.
    return out_t.reshape(OUT_F, b_pad).T[:B]


def init_params(key):
    """Deterministic init mirroring nn.Linear's U(-1/sqrt(fan_in), 1/sqrt(fan_in))."""
    k1, k2, k3, k4 = jax.random.split(key, 4)
    bound1 = 1.0 / jnp.sqrt(float(IN_F))
    bound2 = 1.0 / jnp.sqrt(float(HID_F))
    w1 = jax.random.uniform(k1, (IN_F, HID_F), jnp.float32, -bound1, bound1)
    b1 = jax.random.uniform(k2, (HID_F,), jnp.float32, -bound1, bound1)
    w2 = jax.random.uniform(k3, (HID_F, OUT_F), jnp.float32, -bound2, bound2)
    b2 = jax.random.uniform(k4, (OUT_F,), jnp.float32, -bound2, bound2)
    return w1, b1, w2, b2


if __name__ == "__main__":
    key = jax.random.PRNGKey(0)
    k_params, k_x = jax.random.split(key)
    w1, b1, w2, b2 = init_params(k_params)

    # Small single-tile case (the Iris-sized batch) plus a batch that
    # exercises a 2-step "parallel" grid and the padding path.
    for batch in (8, 4096):
        x = jax.random.normal(jax.random.fold_in(k_x, batch),
                              (batch, IN_F), dtype=jnp.float32)
        out = iris_classifier_forward(x, w1, b1, w2, b2)
        jax.block_until_ready(out)

        # Reference check in plain JAX (same semantics as the PyTorch module).
        ref = jnp.maximum(x @ w1 + b1, 0.0) @ w2 + b2
        assert out.shape == (batch, OUT_F)
        assert jnp.allclose(out, ref, atol=1e-5, rtol=1e-5), batch

    print("KERNEL_OK")
</pallas_src>

<mosaic_0001>
module attributes {stable_mosaic.version = 11 : i64} {
  func.func @_mlp_kernel(%arg0: i32, %arg1: memref<4x5xf32, #tpu.memory_space<smem>>, %arg2: memref<5xf32, #tpu.memory_space<smem>>, %arg3: memref<5x3xf32, #tpu.memory_space<smem>>, %arg4: memref<3xf32, #tpu.memory_space<smem>>, %arg5: memref<4x8x128xf32, #tpu.memory_space<vmem>>, %arg6: memref<3x8x128xf32, #tpu.memory_space<vmem>>) attributes {dimension_semantics = [#tpu.dimension_semantics<parallel>], iteration_bounds = array<i64: 1>, scalar_prefetch = 0 : i64, scratch_operands = 0 : i64, tpu.core_type = #tpu.core_type<tc>, window_params = [{transform_indices = @transform_0, window_bounds = array<i64: 4, 5>}, {transform_indices = @transform_1, window_bounds = array<i64: 5>}, {transform_indices = @transform_2, window_bounds = array<i64: 5, 3>}, {transform_indices = @transform_3, window_bounds = array<i64: 3>}, {transform_indices = @transform_4, window_bounds = array<i64: 4, 8, 128>}, {transform_indices = @transform_5, window_bounds = array<i64: 3, 8, 128>}]} {
    %c0 = arith.constant 0 : index
    %c0_0 = arith.constant 0 : index
    %c0_1 = arith.constant 0 : index
    %0 = vector.load %arg5[%c0, %c0_0, %c0_1] : memref<4x8x128xf32, #tpu.memory_space<vmem>>, vector<1x8x128xf32>
    %1 = vector.shape_cast %0 : vector<1x8x128xf32> to vector<8x128xf32>
    %c1 = arith.constant 1 : index
    %c0_2 = arith.constant 0 : index
    %c0_3 = arith.constant 0 : index
    %2 = vector.load %arg5[%c1, %c0_2, %c0_3] : memref<4x8x128xf32, #tpu.memory_space<vmem>>, vector<1x8x128xf32>
    %3 = vector.shape_cast %2 : vector<1x8x128xf32> to vector<8x128xf32>
    %c2 = arith.constant 2 : index
    %c0_4 = arith.constant 0 : index
    %c0_5 = arith.constant 0 : index
    %4 = vector.load %arg5[%c2, %c0_4, %c0_5] : memref<4x8x128xf32, #tpu.memory_space<vmem>>, vector<1x8x128xf32>
    %5 = vector.shape_cast %4 : vector<1x8x128xf32> to vector<8x128xf32>
    %c3 = arith.constant 3 : index
    %c0_6 = arith.constant 0 : index
    %c0_7 = arith.constant 0 : index
    %6 = vector.load %arg5[%c3, %c0_6, %c0_7] : memref<4x8x128xf32, #tpu.memory_space<vmem>>, vector<1x8x128xf32>
    %7 = vector.shape_cast %6 : vector<1x8x128xf32> to vector<8x128xf32>
    %c0_8 = arith.constant 0 : index
    %c0_9 = arith.constant 0 : index
    %8 = memref.load %arg1[%c0_8, %c0_9] : memref<4x5xf32, #tpu.memory_space<smem>>
    %9 = vector.broadcast %8 : f32 to vector<8x128xf32>
    %10 = arith.mulf %1, %9 : vector<8x128xf32>
    %c1_10 = arith.constant 1 : index
    %c0_11 = arith.constant 0 : index
    %11 = memref.load %arg1[%c1_10, %c0_11] : memref<4x5xf32, #tpu.memory_space<smem>>
    %12 = vector.broadcast %11 : f32 to vector<8x128xf32>
    %13 = arith.mulf %3, %12 : vector<8x128xf32>
    %14 = arith.addf %10, %13 : vector<8x128xf32>
    %c2_12 = arith.constant 2 : index
    %c0_13 = arith.constant 0 : index
    %15 = memref.load %arg1[%c2_12, %c0_13] : memref<4x5xf32, #tpu.memory_space<smem>>
    %16 = vector.broadcast %15 : f32 to vector<8x128xf32>
    %17 = arith.mulf %5, %16 : vector<8x128xf32>
    %18 = arith.addf %14, %17 : vector<8x128xf32>
    %c3_14 = arith.constant 3 : index
    %c0_15 = arith.constant 0 : index
    %19 = memref.load %arg1[%c3_14, %c0_15] : memref<4x5xf32, #tpu.memory_space<smem>>
    %20 = vector.broadcast %19 : f32 to vector<8x128xf32>
    %21 = arith.mulf %7, %20 : vector<8x128xf32>
    %22 = arith.addf %18, %21 : vector<8x128xf32>
    %c0_16 = arith.constant 0 : index
    %23 = memref.load %arg2[%c0_16] : memref<5xf32, #tpu.memory_space<smem>>
    %24 = vector.broadcast %23 : f32 to vector<8x128xf32>
    %25 = arith.addf %22, %24 : vector<8x128xf32>
    %cst = arith.constant 0.000000e+00 : f32
    %26 = vector.broadcast %cst : f32 to vector<8x128xf32>
    %27 = arith.maximumf %25, %26 : vector<8x128xf32>
    %c0_17 = arith.constant 0 : index
    %c1_18 = arith.constant 1 : index
    %28 = memref.load %arg1[%c0_17, %c1_18] : memref<4x5xf32, #tpu.memory_space<smem>>
    %29 = vector.broadcast %28 : f32 to vector<8x128xf32>
    %30 = arith.mulf %1, %29 : vector<8x128xf32>
    %c1_19 = arith.constant 1 : index
    %c1_20 = arith.constant 1 : index
    %31 = memref.load %arg1[%c1_19, %c1_20] : memref<4x5xf32, #tpu.memory_space<smem>>
    %32 = vector.broadcast %31 : f32 to vector<8x128xf32>
    %33 = arith.mulf %3, %32 : vector<8x128xf32>
    %34 = arith.addf %30, %33 : vector<8x128xf32>
    %c2_21 = arith.constant 2 : index
    %c1_22 = arith.constant 1 : index
    %35 = memref.load %arg1[%c2_21, %c1_22] : memref<4x5xf32, #tpu.memory_space<smem>>
    %36 = vector.broadcast %35 : f32 to vector<8x128xf32>
    %37 = arith.mulf %5, %36 : vector<8x128xf32>
    %38 = arith.addf %34, %37 : vector<8x128xf32>
    %c3_23 = arith.constant 3 : index
    %c1_24 = arith.constant 1 : index
    %39 = memref.load %arg1[%c3_23, %c1_24] : memref<4x5xf32, #tpu.memory_space<smem>>
    %40 = vector.broadcast %39 : f32 to vector<8x128xf32>
    %41 = arith.mulf %7, %40 : vector<8x128xf32>
    %42 = arith.addf %38, %41 : vector<8x128xf32>
    %c1_25 = arith.constant 1 : index
    %43 = memref.load %arg2[%c1_25] : memref<5xf32, #tpu.memory_space<smem>>
    %44 = vector.broadcast %43 : f32 to vector<8x128xf32>
    %45 = arith.addf %42, %44 : vector<8x128xf32>
    %cst_26 = arith.constant 0.000000e+00 : f32
    %46 = vector.broadcast %cst_26 : f32 to vector<8x128xf32>
    %47 = arith.maximumf %45, %46 : vector<8x128xf32>
    %c0_27 = arith.constant 0 : index
    %c2_28 = arith.constant 2 : index
    %48 = memref.load %arg1[%c0_27, %c2_28] : memref<4x5xf32, #tpu.memory_space<smem>>
    %49 = vector.broadcast %48 : f32 to vector<8x128xf32>
    %50 = arith.mulf %1, %49 : vector<8x128xf32>
    %c1_29 = arith.constant 1 : index
    %c2_30 = arith.constant 2 : index
    %51 = memref.load %arg1[%c1_29, %c2_30] : memref<4x5xf32, #tpu.memory_space<smem>>
    %52 = vector.broadcast %51 : f32 to vector<8x128xf32>
    %53 = arith.mulf %3, %52 : vector<8x128xf32>
    %54 = arith.addf %50, %53 : vector<8x128xf32>
    %c2_31 = arith.constant 2 : index
    %c2_32 = arith.constant 2 : index
    %55 = memref.load %arg1[%c2_31, %c2_32] : memref<4x5xf32, #tpu.memory_space<smem>>
    %56 = vector.broadcast %55 : f32 to vector<8x128xf32>
    %57 = arith.mulf %5, %56 : vector<8x128xf32>
    %58 = arith.addf %54, %57 : vector<8x128xf32>
    %c3_33 = arith.constant 3 : index
    %c2_34 = arith.constant 2 : index
    %59 = memref.load %arg1[%c3_33, %c2_34] : memref<4x5xf32, #tpu.memory_space<smem>>
    %60 = vector.broadcast %59 : f32 to vector<8x128xf32>
    %61 = arith.mulf %7, %60 : vector<8x128xf32>
    %62 = arith.addf %58, %61 : vector<8x128xf32>
    %c2_35 = arith.constant 2 : index
    %63 = memref.load %arg2[%c2_35] : memref<5xf32, #tpu.memory_space<smem>>
    %64 = vector.broadcast %63 : f32 to vector<8x128xf32>
    %65 = arith.addf %62, %64 : vector<8x128xf32>
    %cst_36 = arith.constant 0.000000e+00 : f32
    %66 = vector.broadcast %cst_36 : f32 to vector<8x128xf32>
    %67 = arith.maximumf %65, %66 : vector<8x128xf32>
    %c0_37 = arith.constant 0 : index
    %c3_38 = arith.constant 3 : index
    %68 = memref.load %arg1[%c0_37, %c3_38] : memref<4x5xf32, #tpu.memory_space<smem>>
    %69 = vector.broadcast %68 : f32 to vector<8x128xf32>
    %70 = arith.mulf %1, %69 : vector<8x128xf32>
    %c1_39 = arith.constant 1 : index
    %c3_40 = arith.constant 3 : index
    %71 = memref.load %arg1[%c1_39, %c3_40] : memref<4x5xf32, #tpu.memory_space<smem>>
    %72 = vector.broadcast %71 : f32 to vector<8x128xf32>
    %73 = arith.mulf %3, %72 : vector<8x128xf32>
    %74 = arith.addf %70, %73 : vector<8x128xf32>
    %c2_41 = arith.constant 2 : index
    %c3_42 = arith.constant 3 : index
    %75 = memref.load %arg1[%c2_41, %c3_42] : memref<4x5xf32, #tpu.memory_space<smem>>
    %76 = vector.broadcast %75 : f32 to vector<8x128xf32>
    %77 = arith.mulf %5, %76 : vector<8x128xf32>
    %78 = arith.addf %74, %77 : vector<8x128xf32>
    %c3_43 = arith.constant 3 : index
    %c3_44 = arith.constant 3 : index
    %79 = memref.load %arg1[%c3_43, %c3_44] : memref<4x5xf32, #tpu.memory_space<smem>>
    %80 = vector.broadcast %79 : f32 to vector<8x128xf32>
    %81 = arith.mulf %7, %80 : vector<8x128xf32>
    %82 = arith.addf %78, %81 : vector<8x128xf32>
    %c3_45 = arith.constant 3 : index
    %83 = memref.load %arg2[%c3_45] : memref<5xf32, #tpu.memory_space<smem>>
    %84 = vector.broadcast %83 : f32 to vector<8x128xf32>
    %85 = arith.addf %82, %84 : vector<8x128xf32>
    %cst_46 = arith.constant 0.000000e+00 : f32
    %86 = vector.broadcast %cst_46 : f32 to vector<8x128xf32>
    %87 = arith.maximumf %85, %86 : vector<8x128xf32>
    %c0_47 = arith.constant 0 : index
    %c4 = arith.constant 4 : index
    %88 = memref.load %arg1[%c0_47, %c4] : memref<4x5xf32, #tpu.memory_space<smem>>
    %89 = vector.broadcast %88 : f32 to vector<8x128xf32>
    %90 = arith.mulf %1, %89 : vector<8x128xf32>
    %c1_48 = arith.constant 1 : index
    %c4_49 = arith.constant 4 : index
    %91 = memref.load %arg1[%c1_48, %c4_49] : memref<4x5xf32, #tpu.memory_space<smem>>
    %92 = vector.broadcast %91 : f32 to vector<8x128xf32>
    %93 = arith.mulf %3, %92 : vector<8x128xf32>
    %94 = arith.addf %90, %93 : vector<8x128xf32>
    %c2_50 = arith.constant 2 : index
    %c4_51 = arith.constant 4 : index
    %95 = memref.load %arg1[%c2_50, %c4_51] : memref<4x5xf32, #tpu.memory_space<smem>>
    %96 = vector.broadcast %95 : f32 to vector<8x128xf32>
    %97 = arith.mulf %5, %96 : vector<8x128xf32>
    %98 = arith.addf %94, %97 : vector<8x128xf32>
    %c3_52 = arith.constant 3 : index
    %c4_53 = arith.constant 4 : index
    %99 = memref.load %arg1[%c3_52, %c4_53] : memref<4x5xf32, #tpu.memory_space<smem>>
    %100 = vector.broadcast %99 : f32 to vector<8x128xf32>
    %101 = arith.mulf %7, %100 : vector<8x128xf32>
    %102 = arith.addf %98, %101 : vector<8x128xf32>
    %c4_54 = arith.constant 4 : index
    %103 = memref.load %arg2[%c4_54] : memref<5xf32, #tpu.memory_space<smem>>
    %104 = vector.broadcast %103 : f32 to vector<8x128xf32>
    %105 = arith.addf %102, %104 : vector<8x128xf32>
    %cst_55 = arith.constant 0.000000e+00 : f32
    %106 = vector.broadcast %cst_55 : f32 to vector<8x128xf32>
    %107 = arith.maximumf %105, %106 : vector<8x128xf32>
    %c0_56 = arith.constant 0 : index
    %c0_57 = arith.constant 0 : index
    %108 = memref.load %arg3[%c0_56, %c0_57] : memref<5x3xf32, #tpu.memory_space<smem>>
    %109 = vector.broadcast %108 : f32 to vector<8x128xf32>
    %110 = arith.mulf %27, %109 : vector<8x128xf32>
    %c1_58 = arith.constant 1 : index
    %c0_59 = arith.constant 0 : index
    %111 = memref.load %arg3[%c1_58, %c0_59] : memref<5x3xf32, #tpu.memory_space<smem>>
    %112 = vector.broadcast %111 : f32 to vector<8x128xf32>
    %113 = arith.mulf %47, %112 : vector<8x128xf32>
    %114 = arith.addf %110, %113 : vector<8x128xf32>
    %c2_60 = arith.constant 2 : index
    %c0_61 = arith.constant 0 : index
    %115 = memref.load %arg3[%c2_60, %c0_61] : memref<5x3xf32, #tpu.memory_space<smem>>
    %116 = vector.broadcast %115 : f32 to vector<8x128xf32>
    %117 = arith.mulf %67, %116 : vector<8x128xf32>
    %118 = arith.addf %114, %117 : vector<8x128xf32>
    %c3_62 = arith.constant 3 : index
    %c0_63 = arith.constant 0 : index
    %119 = memref.load %arg3[%c3_62, %c0_63] : memref<5x3xf32, #tpu.memory_space<smem>>
    %120 = vector.broadcast %119 : f32 to vector<8x128xf32>
    %121 = arith.mulf %87, %120 : vector<8x128xf32>
    %122 = arith.addf %118, %121 : vector<8x128xf32>
    %c4_64 = arith.constant 4 : index
    %c0_65 = arith.constant 0 : index
    %123 = memref.load %arg3[%c4_64, %c0_65] : memref<5x3xf32, #tpu.memory_space<smem>>
    %124 = vector.broadcast %123 : f32 to vector<8x128xf32>
    %125 = arith.mulf %107, %124 : vector<8x128xf32>
    %126 = arith.addf %122, %125 : vector<8x128xf32>
    %c0_66 = arith.constant 0 : index
    %127 = memref.load %arg4[%c0_66] : memref<3xf32, #tpu.memory_space<smem>>
    %128 = vector.broadcast %127 : f32 to vector<8x128xf32>
    %129 = arith.addf %126, %128 : vector<8x128xf32>
    %c0_67 = arith.constant 0 : index
    %c0_68 = arith.constant 0 : index
    %c0_69 = arith.constant 0 : index
    %130 = vector.load %arg6[%c0_67, %c0_68, %c0_69] : memref<3x8x128xf32, #tpu.memory_space<vmem>>, vector<1x8x128xf32>
    %131 = vector.shape_cast %130 : vector<1x8x128xf32> to vector<8x128xf32>
    %132 = vector.shape_cast %129 : vector<8x128xf32> to vector<1x8x128xf32>
    tpu.vector_store %arg6[%c0_67, %c0_68, %c0_69], %132 {strides = array<i32>} : memref<3x8x128xf32, #tpu.memory_space<vmem>>, vector<1x8x128xf32>,
    %c0_70 = arith.constant 0 : index
    %c1_71 = arith.constant 1 : index
    %133 = memref.load %arg3[%c0_70, %c1_71] : memref<5x3xf32, #tpu.memory_space<smem>>
    %134 = vector.broadcast %133 : f32 to vector<8x128xf32>
    %135 = arith.mulf %27, %134 : vector<8x128xf32>
    %c1_72 = arith.constant 1 : index
    %c1_73 = arith.constant 1 : index
    %136 = memref.load %arg3[%c1_72, %c1_73] : memref<5x3xf32, #tpu.memory_space<smem>>
    %137 = vector.broadcast %136 : f32 to vector<8x128xf32>
    %138 = arith.mulf %47, %137 : vector<8x128xf32>
    %139 = arith.addf %135, %138 : vector<8x128xf32>
    %c2_74 = arith.constant 2 : index
    %c1_75 = arith.constant 1 : index
    %140 = memref.load %arg3[%c2_74, %c1_75] : memref<5x3xf32, #tpu.memory_space<smem>>
    %141 = vector.broadcast %140 : f32 to vector<8x128xf32>
    %142 = arith.mulf %67, %141 : vector<8x128xf32>
    %143 = arith.addf %139, %142 : vector<8x128xf32>
    %c3_76 = arith.constant 3 : index
    %c1_77 = arith.constant 1 : index
    %144 = memref.load %arg3[%c3_76, %c1_77] : memref<5x3xf32, #tpu.memory_space<smem>>
    %145 = vector.broadcast %144 : f32 to vector<8x128xf32>
    %146 = arith.mulf %87, %145 : vector<8x128xf32>
    %147 = arith.addf %143, %146 : vector<8x128xf32>
    %c4_78 = arith.constant 4 : index
    %c1_79 = arith.constant 1 : index
    %148 = memref.load %arg3[%c4_78, %c1_79] : memref<5x3xf32, #tpu.memory_space<smem>>
    %149 = vector.broadcast %148 : f32 to vector<8x128xf32>
    %150 = arith.mulf %107, %149 : vector<8x128xf32>
    %151 = arith.addf %147, %150 : vector<8x128xf32>
    %c1_80 = arith.constant 1 : index
    %152 = memref.load %arg4[%c1_80] : memref<3xf32, #tpu.memory_space<smem>>
    %153 = vector.broadcast %152 : f32 to vector<8x128xf32>
    %154 = arith.addf %151, %153 : vector<8x128xf32>
    %c1_81 = arith.constant 1 : index
    %c0_82 = arith.constant 0 : index
    %c0_83 = arith.constant 0 : index
    %155 = vector.load %arg6[%c1_81, %c0_82, %c0_83] : memref<3x8x128xf32, #tpu.memory_space<vmem>>, vector<1x8x128xf32>
    %156 = vector.shape_cast %155 : vector<1x8x128xf32> to vector<8x128xf32>
    %157 = vector.shape_cast %154 : vector<8x128xf32> to vector<1x8x128xf32>
    tpu.vector_store %arg6[%c1_81, %c0_82, %c0_83], %157 {strides = array<i32>} : memref<3x8x128xf32, #tpu.memory_space<vmem>>, vector<1x8x128xf32>,
    %c0_84 = arith.constant 0 : index
    %c2_85 = arith.constant 2 : index
    %158 = memref.load %arg3[%c0_84, %c2_85] : memref<5x3xf32, #tpu.memory_space<smem>>
    %159 = vector.broadcast %158 : f32 to vector<8x128xf32>
    %160 = arith.mulf %27, %159 : vector<8x128xf32>
    %c1_86 = arith.constant 1 : index
    %c2_87 = arith.constant 2 : index
    %161 = memref.load %arg3[%c1_86, %c2_87] : memref<5x3xf32, #tpu.memory_space<smem>>
    %162 = vector.broadcast %161 : f32 to vector<8x128xf32>
    %163 = arith.mulf %47, %162 : vector<8x128xf32>
    %164 = arith.addf %160, %163 : vector<8x128xf32>
    %c2_88 = arith.constant 2 : index
    %c2_89 = arith.constant 2 : index
    %165 = memref.load %arg3[%c2_88, %c2_89] : memref<5x3xf32, #tpu.memory_space<smem>>
    %166 = vector.broadcast %165 : f32 to vector<8x128xf32>
    %167 = arith.mulf %67, %166 : vector<8x128xf32>
    %168 = arith.addf %164, %167 : vector<8x128xf32>
    %c3_90 = arith.constant 3 : index
    %c2_91 = arith.constant 2 : index
    %169 = memref.load %arg3[%c3_90, %c2_91] : memref<5x3xf32, #tpu.memory_space<smem>>
    %170 = vector.broadcast %169 : f32 to vector<8x128xf32>
    %171 = arith.mulf %87, %170 : vector<8x128xf32>
    %172 = arith.addf %168, %171 : vector<8x128xf32>
    %c4_92 = arith.constant 4 : index
    %c2_93 = arith.constant 2 : index
    %173 = memref.load %arg3[%c4_92, %c2_93] : memref<5x3xf32, #tpu.memory_space<smem>>
    %174 = vector.broadcast %173 : f32 to vector<8x128xf32>
    %175 = arith.mulf %107, %174 : vector<8x128xf32>
    %176 = arith.addf %172, %175 : vector<8x128xf32>
    %c2_94 = arith.constant 2 : index
    %177 = memref.load %arg4[%c2_94] : memref<3xf32, #tpu.memory_space<smem>>
    %178 = vector.broadcast %177 : f32 to vector<8x128xf32>
    %179 = arith.addf %176, %178 : vector<8x128xf32>
    %c2_95 = arith.constant 2 : index
    %c0_96 = arith.constant 0 : index
    %c0_97 = arith.constant 0 : index
    %180 = vector.load %arg6[%c2_95, %c0_96, %c0_97] : memref<3x8x128xf32, #tpu.memory_space<vmem>>, vector<1x8x128xf32>
    %181 = vector.shape_cast %180 : vector<1x8x128xf32> to vector<8x128xf32>
    %182 = vector.shape_cast %179 : vector<8x128xf32> to vector<1x8x128xf32>
    tpu.vector_store %arg6[%c2_95, %c0_96, %c0_97], %182 {strides = array<i32>} : memref<3x8x128xf32, #tpu.memory_space<vmem>>, vector<1x8x128xf32>,
    return
  }
  func.func @transform_0(%arg0: i32) -> (i32, i32) {
    %c0_i32 = arith.constant 0 : i32
    %c0_i32_0 = arith.constant 0 : i32
    %c0_i32_1 = arith.constant 0 : i32
    return %c0_i32, %c0_i32_0 : i32, i32
  }
  func.func @transform_1(%arg0: i32) -> i32 {
    %c0_i32 = arith.constant 0 : i32
    %c0_i32_0 = arith.constant 0 : i32
    return %c0_i32 : i32
  }
  func.func @transform_2(%arg0: i32) -> (i32, i32) {
    %c0_i32 = arith.constant 0 : i32
    %c0_i32_0 = arith.constant 0 : i32
    %c0_i32_1 = arith.constant 0 : i32
    return %c0_i32, %c0_i32_0 : i32, i32
  }
  func.func @transform_3(%arg0: i32) -> i32 {
    %c0_i32 = arith.constant 0 : i32
    %c0_i32_0 = arith.constant 0 : i32
    return %c0_i32 : i32
  }
  func.func @transform_4(%arg0: i32) -> (i32, i32, i32) {
    %c0_i32 = arith.constant 0 : i32
    %c0_i32_0 = arith.constant 0 : i32
    %c0_i32_1 = arith.constant 0 : i32
    return %c0_i32, %arg0, %c0_i32_0 : i32, i32, i32
  }
  func.func @transform_5(%arg0: i32) -> (i32, i32, i32) {
    %c0_i32 = arith.constant 0 : i32
    %c0_i32_0 = arith.constant 0 : i32
    %c0_i32_1 = arith.constant 0 : i32
    return %c0_i32, %arg0, %c0_i32_0 : i32, i32, i32
  }
}

</mosaic_0001>

<bundles_post_ra>
// kernel: iris_classifier_forward.1
= control target key start
LH: loop header
LB: loop body
LE: loop exit
PB: predicated region body
PF: predicated region fallthrough
CT: control target
= control target key end

     0   :  { %10 = vsyncpa [#allocation3], 0  ;;  %s558_s0 = inlined_call_operand.vmem [shape: f32[4,5], index: 0, kind: input, shape index: {}]   ;;  %s559_s1 = inlined_call_operand.vmem [shape: f32[5], index: 1, kind: input, shape index: {}]   ;;  %s560_s2 = inlined_call_operand.vmem [shape: f32[5,3], index: 2, kind: input, shape index: {}]   ;;  %s561_s3 = inlined_call_operand.vmem [shape: f32[3], index: 3, kind: input, shape index: {}]   ;;  %s562_s4 = inlined_call_operand.vmem [shape: f32[4,8,128], index: 4, kind: input, shape index: {}]   ;;  %s563_s5 = inlined_call_operand.vmem [shape: f32[3,8,128], index: 5, kind: output, shape index: {}]  }
   0x1   :  { %11 = vsyncpa [#allocation5], 0  ;;  %s29_s20 = sshll.u32 %s559_s1, 4  ;;  %s30_s20 = int_to_ptr.vmem [resolvable:$true] %s29_s20 }
   0x2   :  { %12 = vsyncpa [#allocation8], 0  ;;  %s19_s23 = sshll.u32 %s558_s0, 4  ;;  %s296_s24 = scalar_lea.vmem %s30_s20, 16  ;;  %s20_s23 = int_to_ptr.vmem [resolvable:$true] %s19_s23 }
   0x3   :  { %p297_p0 = scmp.ne.s32.totalorder %s30_s20, %s296_s24  ;;  %p301_p1 = scmp.lt.s32.totalorder %s30_s20, %s30_s20 }
   0x4   :  { %p302_p2 = scmp.lt.s32.totalorder %s296_s24, %s296_s24 }
   0x6   :  { %p303_p3 = por %p302_p2, %p301_p1 }
   0x8   :  { %p304_p4 = pnand %p303_p3, %p297_p0 }
   0xa   :  { %307 = shalt.err (!%p304_p4)
}
   0xb   :  { %s350_s25 = smov [#allocation4]   ;;  %s308_s26 = scalar_lea.vmem %s20_s23, 64 }
   0xc   :  { %32 = dma.vmem_to_smem %s30_s20, 16, %s350_s25, [#allocation5]  }
   0xd   :  { %p309_p5 = scmp.ne.s32.totalorder %s20_s23, %s308_s26  ;;  %p313_p6 = scmp.lt.s32.totalorder %s20_s23, %s20_s23 }
   0xe   :  { %p314_p7 = scmp.lt.s32.totalorder %s308_s26, %s308_s26 }
  0x10   :  { %p315_p8 = por %p314_p7, %p313_p6 }
  0x12   :  { %p316_p9 = pnand %p315_p8, %p309_p5 }
  0x14   :  { %319 = shalt.err (!%p316_p9)
}
  0x15   :  { %s351_s1 = smov [#allocation2]   ;;  %s39_s28 = sshll.u32 %s560_s2, 4  ;;  %s40_s28 = int_to_ptr.vmem [resolvable:$true] %s39_s28 }
  0x16   :  { %22 = dma.vmem_to_smem %s20_s23, 64, %s351_s1, [#allocation3]  }
  0x17   :  { %s49_s6 = sshll.u32 %s561_s3, 4  ;;  %s320_s7 = scalar_lea.vmem %s40_s28, 128  ;;  %s50_s6 = int_to_ptr.vmem [resolvable:$true] %s49_s6 }
  0x18   :  { %p321_p10 = scmp.ne.s32.totalorder %s40_s28, %s320_s7  ;;  %p325_p11 = scmp.lt.s32.totalorder %s40_s28, %s40_s28 }
  0x19   :  { %p326_p12 = scmp.lt.s32.totalorder %s320_s7, %s320_s7 }
  0x1b   :  { %p327_p13 = por %p326_p12, %p325_p11 }
  0x1d   :  { %p328_p0 = pnand %p327_p13, %p321_p10 }
  0x1f   :  { %331 = shalt.err (!%p328_p0)
}
  0x20   :  { %s352_s8 = smov [#allocation6]   ;;  %s332_s9 = scalar_lea.vmem %s50_s6, 16 }
  0x21   :  { %42 = dma.vmem_to_smem %s40_s28, 128, %s352_s8, [#allocation5]  }
  0x22   :  { %p333_p1 = scmp.ne.s32.totalorder %s50_s6, %s332_s9  ;;  %p337_p2 = scmp.lt.s32.totalorder %s50_s6, %s50_s6 }
  0x23   :  { %p338_p3 = scmp.lt.s32.totalorder %s332_s9, %s332_s9 }
  0x25   :  { %p339_p4 = por %p338_p3, %p337_p2 }
  0x27   :  { %p340_p5 = pnand %p339_p4, %p333_p1 }
  0x29   :  { %343 = shalt.err (!%p340_p5)
}
  0x2a   :  { %s353_s2 = smov [#allocation7]  }
  0x2b   :  { %52 = dma.vmem_to_smem %s50_s6, 16, %s353_s2, [#allocation8]  }
  0x2c   :  { %344 = dma.done.wait [#allocation3], 64  }
  0x2d   :  { %345 = vsyncadd [#allocation3], 4294967232 }
  0x2e   :  { %346 = dma.done.wait [#allocation5], 144  }
  0x2f   :  { %347 = vsyncadd [#allocation5], 4294967152 }
  0x30   :  { %348 = dma.done.wait [#allocation8], 16  }
  0x31   :  { %349 = vsyncadd [#allocation8], 4294967280 }
  0x32   :  { %67 = sfence }
  0x33   :  { %s75_s3 = sld [smem:[#allocation2]]  ;;  %s254_s14 = sld [smem:[#allocation2 + $0x1]]  ;;  %v401_v0 = vld [vmem:[%s562_s4] sm:$0xff]  ;;  %v410_v1 = vld [vmem:[%s562_s4 + $0x8] sm:$0xff]  ;;  %v415_v2 = vld [vmem:[%s562_s4 + $0x10] sm:$0xff] }
  0x34   :  { %s251_s10 = sld [smem:[#allocation2 + $0x80]]  ;;  %s255_s15 = sld [smem:[#allocation2 + $0x81]]  ;;  %v424_v3 = vld [vmem:[%s562_s4 + $0x18] sm:$0xff] }
  0x35   :  { %s252_s11 = sld [smem:[#allocation2 + $0x100]]  ;;  %s403_s18 = sld [smem:[#allocation2 + $0x101]] }
  0x36   :  { %s253_s12 = sld [smem:[#allocation2 + $0x180]]  ;;  %s405_s19 = sld [smem:[#allocation2 + $0x181]] }
  0x37   :  { %s396_s13 = sld [smem:[#allocation4]]  ;;  %s417_s24 = sld [smem:[#allocation4 + $0x1]] }
  0x38   :  { %s419_s25 = sld [smem:[#allocation2 + $0x2]]  ;;  %s437_s4 = sld [smem:[#allocation2 + $0x3]] }
  0x39   :  { %v76_v4 = vstv %s75_s3  ;;  %s426_s0 = sld [smem:[#allocation2 + $0x82]]  ;;  %s439_s30 = sld [smem:[#allocation2 + $0x83]]  ;;  %v95_v12 = vstv %s254_s14 }
  0x3a   :  { %s428_s27 = sld [smem:[#allocation2 + $0x102]]  ;;  %v77_v5 = vmul.f32 %v76_v4, %v401_v0  ;;  %v79_v6 = vstv %s251_s10  ;;  %v98_v13 = vstv %s255_s15  ;;  %s442_s6 = sld [smem:[#allocation2 + $0x103]]  ;;  %v96_v15 = vmul.f32 %v95_v12, %v401_v0 }
  0x3b   :  { %v83_v7 = vstv %s252_s11  ;;  %s431_s28 = sld [smem:[#allocation2 + $0x182]]  ;;  %v80_v8 = vmul.f32 %v410_v1, %v79_v6  ;;  %s444_s7 = sld [smem:[#allocation2 + $0x183]]  ;;  %v99_v16 = vmul.f32 %v410_v1, %v98_v13  ;;  %v102_v17 = vstv %s403_s18 }
  0x3c   :  { %s433_s29 = sld [smem:[#allocation4 + $0x2]]  ;;  %v84_v9 = vmul.f32 %v415_v2, %v83_v7  ;;  %v87_v10 = vstv %s253_s12  ;;  %s449_s8 = sld [smem:[#allocation2 + $0x4]]  ;;  %v103_v19 = vmul.f32 %v415_v2, %v102_v17  ;;  %v106_v20 = vstv %s405_s19 }
  0x3d   :  { %v88_v11 = vmul.f32 %v424_v3, %v87_v10  ;;  %v81_v14 = vadd.f32 %v80_v8, %v77_v5  ;;  %v91_v18 = vstv %s396_s13  ;;  %s455_s9 = sld [smem:[#allocation2 + $0x84]]  ;;  %v100_v23 = vadd.f32 %v99_v16, %v96_v15  ;;  %s465_s3 = sld [smem:[#allocation4 + $0x3]] }
  0x3e   :  { %v114_v21 = vstv %s419_s25  ;;  %s457_s2 = sld [smem:[#allocation2 + $0x104]]  ;;  %v107_v24 = vmul.f32 %v424_v3, %v106_v20  ;;  %v110_v26 = vstv %s417_s24  ;;  %s471_s11 = sld [smem:[#allocation6]]  ;;  %v133_v35 = vstv %s437_s4 }
  0x3f   :  { %v85_v22 = vadd.f32 %v84_v9, %v81_v14  ;;  %v115_v25 = vmul.f32 %v114_v21, %v401_v0  ;;  %v117_v27 = vstv %s426_s0  ;;  %s467_s10 = sld [smem:[#allocation2 + $0x184]]  ;;  %v104_v31 = vadd.f32 %v103_v19, %v100_v23  ;;  %s477_s12 = sld [smem:[#allocation6 + $0x80]] }
  0x40   :  { %v121_v28 = vstv %s428_s27  ;;  %v118_v32 = vmul.f32 %v410_v1, %v117_v27  ;;  %v136_v36 = vstv %s439_s30  ;;  %v140_v37 = vstv %s442_s6  ;;  %s479_s13 = sld [smem:[#allocation6 + $0x100]]  ;;  %s482_s14 = sld [smem:[#allocation4 + $0x4]] }
  0x41   :  { %v125_v29 = vstv %s431_s28  ;;  %v89_v30 = vadd.f32 %v88_v11, %v85_v22  ;;  %v122_v33 = vmul.f32 %v415_v2, %v121_v28  ;;  %v108_v39 = vadd.f32 %v107_v24, %v104_v31  ;;  %s488_s15 = sld [smem:[#allocation6 + $0x180]]  ;;  %s490_s16 = sld [smem:[#allocation6 + $0x1]] }
  0x42   :  { %v126_v34 = vmul.f32 %v424_v3, %v125_v29  ;;  %v119_v40 = vadd.f32 %v118_v32, %v115_v25  ;;  %v134_v41 = vmul.f32 %v133_v35, %v401_v0  ;;  %v129_v42 = vstv %s433_s29  ;;  %s495_s17 = sld [smem:[#allocation6 + $0x81]]  ;;  %s509_s20 = sld [smem:[#allocation6 + $0x200]] }
  0x43   :  { %v92_v38 = vadd.f32 %v91_v18, %v89_v30  ;;  %v137_v43 = vmul.f32 %v410_v1, %v136_v36  ;;  %v141_v44 = vmul.f32 %v415_v2, %v140_v37  ;;  %v144_v45 = vstv %s444_s7  ;;  %s500_s18 = sld [smem:[#allocation6 + $0x101]]  ;;  %s515_s22 = sld [smem:[#allocation6 + $0x2]] }
  0x44   :  { %v111_v47 = vadd.f32 %v110_v26, %v108_v39  ;;  %v123_v48 = vadd.f32 %v122_v33, %v119_v40  ;;  %v145_v49 = vmul.f32 %v424_v3, %v144_v45  ;;  %v152_v51 = vstv %s449_s8  ;;  %s502_s19 = sld [smem:[#allocation6 + $0x181]]  ;;  %s517_s23 = sld [smem:[#allocation6 + $0x82]] }
  0x45   :  { %v492_v46 = vmax.f32 %v92_v38, 0.0  ;;  %v138_v50 = vadd.f32 %v137_v43, %v134_v41  ;;  %v155_v52 = vstv %s455_s9  ;;  %v159_v53 = vstv %s457_s2  ;;  %s511_s21 = sld [smem:[#allocation6 + $0x201]]  ;;  %s522_s24 = sld [smem:[#allocation6 + $0x102]] }
  0x46   :  { %v112_v54 = vmax.f32 %v111_v47, 0.0  ;;  %v127_v55 = vadd.f32 %v126_v34, %v123_v48  ;;  %v153_v56 = vmul.f32 %v152_v51, %v401_v0  ;;  %v156_v57 = vmul.f32 %v410_v1, %v155_v52  ;;  %s524_s25 = sld [smem:[#allocation7]]  ;;  %s529_s26 = sld [smem:[#allocation6 + $0x182]] }
  0x47   :  { %v142_v58 = vadd.f32 %v141_v44, %v138_v50  ;;  %v148_v59 = vstv %s465_s3  ;;  %v160_v60 = vmul.f32 %v415_v2, %v159_v53  ;;  %v163_v61 = vstv %s467_s10  ;;  %s531_s1 = sld [smem:[#allocation6 + $0x202]]  ;;  %s537_s0 = sld [smem:[#allocation7 + $0x1]] }
  0x48   :  { %v130_v62 = vadd.f32 %v129_v42, %v127_v55  ;;  %v157_v63 = vadd.f32 %v156_v57, %v153_v56  ;;  %v164_v4 = vmul.f32 %v424_v3, %v163_v61  ;;  %v171_v0 = vstv %s471_s11  ;;  %s290_s27 = sld [smem:[#allocation7 + $0x2]] }
  0x49   :  { %v146_v1 = vadd.f32 %v145_v49, %v142_v58  ;;  %v172_v2 = vmul.f32 %v171_v0, %v492_v46  ;;  %v174_v5 = vstv %s477_s12  ;;  %v178_v6 = vstv %s479_s13 }
  0x4a   :  { %v131_v7 = vmax.f32 %v130_v62, 0.0  ;;  %v161_v8 = vadd.f32 %v160_v60, %v157_v63  ;;  %v175_v9 = vmul.f32 %v174_v5, %v112_v54  ;;  %v167_v10 = vstv %s482_s14 }
  0x4b   :  { %v149_v3 = vadd.f32 %v148_v59, %v146_v1  ;;  %v182_v11 = vstv %s488_s15  ;;  %v194_v12 = vstv %s490_s16  ;;  %v197_v18 = vstv %s495_s17 }
  0x4c   :  { %v165_v13 = vadd.f32 %v164_v4, %v161_v8  ;;  %v176_v14 = vadd.f32 %v175_v9, %v172_v2  ;;  %v179_v15 = vmul.f32 %v178_v6, %v131_v7  ;;  %v195_v16 = vmul.f32 %v194_v12, %v492_v46 }
  0x4d   :  { %v150_v17 = vmax.f32 %v149_v3, 0.0  ;;  %v201_v19 = vstv %s500_s18  ;;  %v205_v20 = vstv %s502_s19  ;;  %v198_v23 = vmul.f32 %v197_v18, %v112_v54 }
  0x4e   :  { %v168_v21 = vadd.f32 %v167_v10, %v165_v13  ;;  %v180_v22 = vadd.f32 %v179_v15, %v176_v14  ;;  %v202_v24 = vmul.f32 %v201_v19, %v131_v7  ;;  %v186_v26 = vstv %s509_s20 }
  0x4f   :  { %v183_v25 = vmul.f32 %v182_v11, %v150_v17  ;;  %v206_v27 = vmul.f32 %v205_v20, %v150_v17  ;;  %v209_v28 = vstv %s511_s21  ;;  %v199_v30 = vadd.f32 %v198_v23, %v195_v16 }
  0x50   :  { %v169_v29 = vmax.f32 %v168_v21, 0.0  ;;  %v218_v31 = vstv %s515_s22  ;;  %v221_v32 = vstv %s517_s23  ;;  %v225_v36 = vstv %s522_s24 }
  0x51   :  { %v184_v33 = vadd.f32 %v183_v25, %v180_v22  ;;  %v219_v34 = vmul.f32 %v218_v31, %v492_v46  ;;  %v222_v35 = vmul.f32 %v221_v32, %v112_v54  ;;  %v203_v38 = vadd.f32 %v202_v24, %v199_v30 }
  0x52   :  { %v187_v37 = vmul.f32 %v186_v26, %v169_v29  ;;  %v210_v39 = vmul.f32 %v209_v28, %v169_v29  ;;  %v226_v40 = vmul.f32 %v225_v36, %v131_v7  ;;  %v190_v41 = vstv %s524_s25 }
  0x53   :  { %v223_v42 = vadd.f32 %v222_v35, %v219_v34  ;;  %v229_v43 = vstv %s529_s26  ;;  %v233_v44 = vstv %s531_s1  ;;  %v207_v47 = vadd.f32 %v206_v27, %v203_v38 }
  0x54   :  { %v188_v45 = vadd.f32 %v187_v37, %v184_v33  ;;  %v230_v48 = vmul.f32 %v229_v43, %v150_v17  ;;  %v213_v49 = vstv %s537_s0  ;;  %v234_v51 = vmul.f32 %v233_v44, %v169_v29 }
  0x55   :  { %v227_v50 = vadd.f32 %v226_v40, %v223_v42  ;;  %v211_v53 = vadd.f32 %v210_v39, %v207_v47  ;;  %v237_v54 = vstv %s290_s27 }
  0x56   :  { %v191_v52 = vadd.f32 %v190_v41, %v188_v45 }
  0x57   :  { %v231_v55 = vadd.f32 %v230_v48, %v227_v50  ;;  %v214_v46 = vadd.f32 %v213_v49, %v211_v53 }
  0x58   :  { %192 = vst [vmem:[%s563_s5] sm:$0xff] %v191_v52 }
  0x59   :  { %v235_v56 = vadd.f32 %v234_v51, %v231_v55  ;;  %284 = vst [vmem:[%s563_s5 + $0x8] sm:$0xff] %v214_v46 }
  0x5b   :  { %v238_v57 = vadd.f32 %v237_v54, %v235_v56 }
  0x5d   :  { %291 = vst [vmem:[%s563_s5 + $0x10] sm:$0xff] %v238_v57 }
  0x5e   :  { %245 = vsyncpa [#allocation3], 1 }
  0x5f   :  { %246 = vsyncpa [#allocation5], 1 }
  0x60   :  { %247 = vsyncpa [#allocation8], 1 }

</bundles_post_ra>
